<compile_context>
chip_gen: v7x
topology: tpu7x:2x2x1
jax: 0.10.0
libtpu: 0.0.40
codegen_flags: <defaults>
</compile_context>

<pallas_src>
import functools

import jax
import jax.numpy as jnp
from jax.experimental import pallas as pl
from jax.experimental.pallas import tpu as pltpu


def _round_up(x, m):
    return ((x + m - 1) // m) * m


def _vmem_capacity_bytes():
    # Per-TC VMEM capacity; conservative (v7x) fallback if the query is unavailable.
    try:
        return int(pltpu.get_tpu_info().vmem_capacity_bytes)
    except Exception:
        return 64 << 20


def _plan_tiles(B, S, E, Hp, Cp, vmem_capacity):
    """Static (Python-int) tile planning from a per-generation VMEM budget."""
    x_itemsize = 2  # bf16 x stream

    # Leave headroom for compiler-internal scratch: ~104 MiB on 128 MiB parts (v5e/v6e),
    # ~40 MiB on 64 MiB parts (v7x).
    vmem_cap = max(vmem_capacity - (24 << 20), vmem_capacity // 2)
    budget = int(vmem_cap * 0.85)

    # Resident weights/biases; the default pipeline allocates 2 buffers per input.
    # TODO(synk): once pl.Buffered(1) is verified on the target jax/Mosaic version, mark the
    # six resident weight/bias specs pipeline_mode=pl.Buffered(1) and drop the 2x here.
    w_bytes = 2 * ((E * Hp + Hp * Hp + Hp * Cp) * 2 + (2 * Hp + Cp) * 4)
    tile_budget = max(budget - w_bytes, 1 << 20)
    # TODO(synk): if E/H grow enough that double-buffered resident weights outgrow the budget
    # (threshold is ~2x lower on v7x), switch to a K-reduction grid axis with an f32
    # accumulator instead of the all-resident layout.

    def max_rows(ts):
        # 2 x-buffers (bf16) + 2 out-buffers (f32) + 1 acc scratch row (f32), per batch row.
        per_row = 2 * ts * E * x_itemsize + 2 * Cp * 4 + E * 4
        return (tile_budget // per_row) // 8 * 8

    tb_target = min(512, _round_up(B, 8))
    tb_floor = min(64, _round_up(B, 8))

    # Shrink the sequence chunk (multiple of 16, bf16-sublane friendly) until a useful
    # batch tile fits; TS == S means "whole sequence in one chunk".
    TS = S
    while max_rows(TS) < tb_floor and TS > 16:
        TS = max(16, _round_up(TS // 2, 16))

    TB = max(8, min(tb_target, max_rows(TS)))

    # Megacore (v7x has 2 TCs): guarantee >= 2 batch grid steps when the batch allows it.
    if B > 8 and _round_up(B, TB) // TB < 2:
        TB = _round_up(pl.cdiv(B, 2), 8)

    Bp = _round_up(B, TB)
    Sp = S if TS == S else _round_up(S, TS)

    est = (w_bytes
           + 2 * TB * TS * E * x_itemsize   # double-buffered x tiles
           + 2 * TB * Cp * 4                # double-buffered output tiles
           + TB * E * 4)                    # accumulator scratch
    vmem_limit = min(vmem_cap, max(est + (4 << 20), 16 << 20))
    return TB, TS, Bp, Sp, vmem_limit


def mlp_kernel(x_ref, w1_ref, b1_ref, w2_ref, b2_ref, w3_ref, b3_ref,
               o_ref, acc_ref, *, inv_seq_len):
    sj = pl.program_id(1)

    @pl.when(sj == 0)
    def _():
        acc_ref[...] = jnp.zeros_like(acc_ref)

    # Partial sequence sum: x streamed as bf16, accumulated in f32 (VPU).
    acc_ref[...] += jnp.sum(x_ref[...].astype(jnp.float32), axis=1)       # (TB, E)

    @pl.when(sj == pl.num_programs(1) - 1)
    def _():
        x_mean = acc_ref[...] * inv_seq_len                               # (TB, E) f32

        # Layer 1 + ReLU: bf16 MXU operands, f32 accumulation, f32 elementwise.
        h1 = jnp.dot(x_mean.astype(jnp.bfloat16), w1_ref[...],
                     preferred_element_type=jnp.float32) + b1_ref[...]
        h1 = jnp.maximum(h1, 0.0)                                         # (TB, Hp)

        # Layer 2 + ReLU
        h2 = jnp.dot(h1.astype(jnp.bfloat16), w2_ref[...],
                     preferred_element_type=jnp.float32) + b2_ref[...]
        h2 = jnp.maximum(h2, 0.0)                                         # (TB, Hp)

        # Output layer (no activation)
        out = jnp.dot(h2.astype(jnp.bfloat16), w3_ref[...],
                      preferred_element_type=jnp.float32) + b3_ref[...]
        o_ref[...] = out.astype(o_ref.dtype)                              # (TB, Cp)


def prepare_params(w1, b1, w2, b2, w3, b3):
    """One-time weight prep: pad H/C to 128 lanes, cast weights to bf16 (biases stay f32).

    Hoisted out of the per-call path so each forward does not re-read/re-write the
    weights in HBM. Zero-padded columns stay exactly zero through bias+ReLU and
    contribute nothing downstream.
    """
    E, H = w1.shape
    C = w3.shape[1]
    Hp = _round_up(H, 128)
    Cp = _round_up(C, 128)

    w1_p = jnp.pad(w1, ((0, 0), (0, Hp - H))).astype(jnp.bfloat16)
    b1_p = jnp.pad(b1, ((0, 0), (0, Hp - H))).astype(jnp.float32)
    w2_p = jnp.pad(w2, ((0, Hp - H), (0, Hp - H))).astype(jnp.bfloat16)
    b2_p = jnp.pad(b2, ((0, 0), (0, Hp - H))).astype(jnp.float32)
    w3_p = jnp.pad(w3, ((0, Hp - H), (0, Cp - C))).astype(jnp.bfloat16)
    b3_p = jnp.pad(b3, ((0, 0), (0, Cp - C))).astype(jnp.float32)
    return w1_p, b1_p, w2_p, b2_p, w3_p, b3_p


@functools.partial(jax.jit, static_argnames=("num_classes",))
def mlp_forward(x, w1_p, b1_p, w2_p, b2_p, w3_p, b3_p, *, num_classes):
    B, S, E = x.shape
    Hp = w1_p.shape[1]
    Cp = w3_p.shape[1]
    assert w1_p.shape[0] == E

    TB, TS, Bp, Sp, vmem_limit = _plan_tiles(B, S, E, Hp, Cp, _vmem_capacity_bytes())

    # Stream x as bf16 (halves HBM traffic and the x VMEM tile); zero-pad batch/seq.
    # Padded seq rows add 0 to the sum; padded batch rows are sliced off afterwards.
    x_p = jnp.pad(x.astype(jnp.bfloat16), ((0, Bp - B), (0, Sp - S), (0, 0)))

    grid = (Bp // TB, Sp // TS)
    const2 = lambda i, j: (0, 0)

    out_padded = pl.pallas_call(
        functools.partial(mlp_kernel, inv_seq_len=1.0 / S),
        out_shape=jax.ShapeDtypeStruct((Bp, Cp), jnp.float32),
        grid_spec=pltpu.PrefetchScalarGridSpec(
            num_scalar_prefetch=0,
            grid=grid,
            in_specs=[
                pl.BlockSpec((TB, TS, E), lambda i, j: (i, j, 0)),  # x: streamed tile
                pl.BlockSpec((E, Hp), const2),                      # w1: resident
                pl.BlockSpec((1, Hp), const2),                      # b1: resident
                pl.BlockSpec((Hp, Hp), const2),                     # w2: resident
                pl.BlockSpec((1, Hp), const2),                      # b2: resident
                pl.BlockSpec((Hp, Cp), const2),                     # w3: resident
                pl.BlockSpec((1, Cp), const2),                      # b3: resident
            ],
            out_specs=pl.BlockSpec((TB, Cp), lambda i, j: (i, 0)),  # resident across seq axis
            scratch_shapes=[pltpu.VMEM((TB, E), jnp.float32)],      # pooled-sum accumulator
        ),
        compiler_params=pltpu.CompilerParams(
            dimension_semantics=("parallel", "arbitrary"),
            vmem_limit_bytes=int(vmem_limit),
        ),
    )(x_p, w1_p, b1_p, w2_p, b2_p, w3_p, b3_p)

    return out_padded[:B, :num_classes]


def init_params(key, embedding_dim, hidden_dim, num_classes):
    # Deterministic synthetic init mimicking nn.Linear's uniform(-1/sqrt(fan_in), 1/sqrt(fan_in)).
    ks = jax.random.split(key, 6)

    def lin(kw, kb, fan_in, fan_out):
        bound = 1.0 / jnp.sqrt(fan_in)
        w = jax.random.uniform(kw, (fan_in, fan_out), jnp.float32, -bound, bound)
        b = jax.random.uniform(kb, (1, fan_out), jnp.float32, -bound, bound)
        return w, b

    w1, b1 = lin(ks[0], ks[1], embedding_dim, hidden_dim)
    w2, b2 = lin(ks[2], ks[3], hidden_dim, hidden_dim)
    w3, b3 = lin(ks[4], ks[5], hidden_dim, num_classes)
    return w1, b1, w2, b2, w3, b3


def reference_forward(x, w1, b1, w2, b2, w3, b3):
    # Pure-JAX f32 reference for correctness checking.
    xm = jnp.mean(x, axis=1)
    h1 = jnp.maximum(xm @ w1 + b1, 0.0)
    h2 = jnp.maximum(h1 @ w2 + b2, 0.0)
    return h2 @ w3 + b3


if __name__ == "__main__":
    # Small shapes consistent with the module: (batch, seq, embedding_dim) -> (batch, num_classes)
    batch, seq, embedding_dim = 4, 8, 32
    hidden_dim, num_classes = 16, 3

    key = jax.random.PRNGKey(0)
    kx, kp = jax.random.split(key)
    x = jax.random.normal(kx, (batch, seq, embedding_dim), jnp.float32)
    params = init_params(kp, embedding_dim, hidden_dim, num_classes)
    prepared = prepare_params(*params)

    out = mlp_forward(x, *prepared, num_classes=num_classes)
    out = jax.block_until_ready(out)

    ref = reference_forward(x, *params)
    assert out.shape == (batch, num_classes)
    # bf16 x stream + bf16 MXU operands with f32 accumulation -> small deviation from f32 ref.
    assert jnp.allclose(out, ref, atol=5e-2, rtol=5e-2), (out, ref)

    print("KERNEL_OK")
</pallas_src>

<mosaic_0001>
module attributes {stable_mosaic.version = 11 : i64} {
  func.func @mlp_kernel(%arg0: i32, %arg1: i32, %arg2: memref<8x8x32xbf16, #tpu.memory_space<vmem>>, %arg3: memref<32x128xbf16, #tpu.memory_space<vmem>>, %arg4: memref<1x128xf32, #tpu.memory_space<vmem>>, %arg5: memref<128x128xbf16, #tpu.memory_space<vmem>>, %arg6: memref<1x128xf32, #tpu.memory_space<vmem>>, %arg7: memref<128x128xbf16, #tpu.memory_space<vmem>>, %arg8: memref<1x128xf32, #tpu.memory_space<vmem>>, %arg9: memref<8x128xf32, #tpu.memory_space<vmem>>, %arg10: memref<8x32xf32, #tpu.memory_space<vmem>>) attributes {dimension_semantics = [#tpu.dimension_semantics<parallel>, #tpu.dimension_semantics<arbitrary>], iteration_bounds = array<i64: 1, 1>, scalar_prefetch = 0 : i64, scratch_operands = 1 : i64, tpu.core_type = #tpu.core_type<tc>, window_params = [{transform_indices = @transform_0, window_bounds = array<i64: 8, 8, 32>}, {pipeline_mode = #tpu.pipeline_mode<synchronous>, transform_indices = @transform_1, window_bounds = array<i64: 32, 128>}, {pipeline_mode = #tpu.pipeline_mode<synchronous>, transform_indices = @transform_2, window_bounds = array<i64: 1, 128>}, {pipeline_mode = #tpu.pipeline_mode<synchronous>, transform_indices = @transform_3, window_bounds = array<i64: 128, 128>}, {pipeline_mode = #tpu.pipeline_mode<synchronous>, transform_indices = @transform_4, window_bounds = array<i64: 1, 128>}, {pipeline_mode = #tpu.pipeline_mode<synchronous>, transform_indices = @transform_5, window_bounds = array<i64: 128, 128>}, {pipeline_mode = #tpu.pipeline_mode<synchronous>, transform_indices = @transform_6, window_bounds = array<i64: 1, 128>}, {transform_indices = @transform_7, window_bounds = array<i64: 8, 128>}]} {
    %c0_i32 = arith.constant 0 : i32
    %0 = arith.cmpi eq, %arg1, %c0_i32 : i32
    %1 = arith.extui %0 : i1 to i32
    %c0_i32_0 = arith.constant 0 : i32
    %2 = arith.cmpi ne, %1, %c0_i32_0 : i32
    scf.if %2 {
      %cst_9 = arith.constant 0.000000e+00 : f32
      %12 = vector.broadcast %cst_9 : f32 to vector<8x32xf32>
      %c0_10 = arith.constant 0 : index
      %c0_11 = arith.constant 0 : index
      %13 = vector.load %arg10[%c0_10, %c0_11] : memref<8x32xf32, #tpu.memory_space<vmem>>, vector<8x32xf32>
      tpu.vector_store %arg10[%c0_10, %c0_11], %12 {strides = array<i32>} : memref<8x32xf32, #tpu.memory_space<vmem>>, vector<8x32xf32>,
    } else {
    }
    %c0 = arith.constant 0 : index
    %c0_1 = arith.constant 0 : index
    %3 = vector.load %arg10[%c0, %c0_1] : memref<8x32xf32, #tpu.memory_space<vmem>>, vector<8x32xf32>
    %c0_2 = arith.constant 0 : index
    %c0_3 = arith.constant 0 : index
    %c0_4 = arith.constant 0 : index
    %4 = vector.load %arg2[%c0_2, %c0_3, %c0_4] : memref<8x8x32xbf16, #tpu.memory_space<vmem>>, vector<8x8x32xbf16>
    %5 = arith.extf %4 : vector<8x8x32xbf16> to vector<8x8x32xf32>
    %cst = arith.constant dense<0.000000e+00> : vector<8x32xf32>
    %6 = vector.multi_reduction <add>, %5, %cst [1] : vector<8x8x32xf32> to vector<8x32xf32>
    %7 = arith.addf %3, %6 : vector<8x32xf32>
    %c0_5 = arith.constant 0 : index
    %c0_6 = arith.constant 0 : index
    %8 = vector.load %arg10[%c0_5, %c0_6] : memref<8x32xf32, #tpu.memory_space<vmem>>, vector<8x32xf32>
    tpu.vector_store %arg10[%c0_5, %c0_6], %7 {strides = array<i32>} : memref<8x32xf32, #tpu.memory_space<vmem>>, vector<8x32xf32>,
    %c0_i32_7 = arith.constant 0 : i32
    %9 = arith.cmpi eq, %arg1, %c0_i32_7 : i32
    %10 = arith.extui %9 : i1 to i32
    %c0_i32_8 = arith.constant 0 : i32
    %11 = arith.cmpi ne, %10, %c0_i32_8 : i32
    scf.if %11 {
      %c0_9 = arith.constant 0 : index
      %c0_10 = arith.constant 0 : index
      %12 = vector.load %arg10[%c0_9, %c0_10] : memref<8x32xf32, #tpu.memory_space<vmem>>, vector<8x32xf32>
      %cst_11 = arith.constant 1.250000e-01 : f32
      %13 = vector.broadcast %cst_11 : f32 to vector<8x32xf32>
      %14 = arith.mulf %12, %13 : vector<8x32xf32>
      %15 = arith.truncf %14 : vector<8x32xf32> to vector<8x32xbf16>
      %c0_12 = arith.constant 0 : index
      %c0_13 = arith.constant 0 : index
      %16 = vector.load %arg3[%c0_12, %c0_13] : memref<32x128xbf16, #tpu.memory_space<vmem>>, vector<32x128xbf16>
      %cst_14 = arith.constant dense<0.000000e+00> : vector<8x128xf32>
      %17 = tpu.matmul %15, %16, %cst_14 {dimension_numbers = #tpu.dot_dimension_numbers<[1], [0], [0], [1], [0, 0, 1, 1], [], []>} : vector<8x32xbf16>, vector<32x128xbf16>, vector<8x128xf32> -> vector<8x128xf32>
      %c0_15 = arith.constant 0 : index
      %c0_16 = arith.constant 0 : index
      %18 = vector.load %arg4[%c0_15, %c0_16] : memref<1x128xf32, #tpu.memory_space<vmem>>, vector<1x128xf32>
      %19 = vector.broadcast %18 : vector<1x128xf32> to vector<8x128xf32>
      %20 = arith.addf %17, %19 : vector<8x128xf32>
      %cst_17 = arith.constant 0.000000e+00 : f32
      %21 = vector.broadcast %cst_17 : f32 to vector<8x128xf32>
      %22 = arith.maximumf %20, %21 : vector<8x128xf32>
      %23 = arith.truncf %22 : vector<8x128xf32> to vector<8x128xbf16>
      %c0_18 = arith.constant 0 : index
      %c0_19 = arith.constant 0 : index
      %24 = vector.load %arg5[%c0_18, %c0_19] : memref<128x128xbf16, #tpu.memory_space<vmem>>, vector<128x128xbf16>
      %cst_20 = arith.constant dense<0.000000e+00> : vector<8x128xf32>
      %25 = tpu.matmul %23, %24, %cst_20 {dimension_numbers = #tpu.dot_dimension_numbers<[1], [0], [0], [1], [0, 0, 1, 1], [], []>} : vector<8x128xbf16>, vector<128x128xbf16>, vector<8x128xf32> -> vector<8x128xf32>
      %c0_21 = arith.constant 0 : index
      %c0_22 = arith.constant 0 : index
      %26 = vector.load %arg6[%c0_21, %c0_22] : memref<1x128xf32, #tpu.memory_space<vmem>>, vector<1x128xf32>
      %27 = vector.broadcast %26 : vector<1x128xf32> to vector<8x128xf32>
      %28 = arith.addf %25, %27 : vector<8x128xf32>
      %cst_23 = arith.constant 0.000000e+00 : f32
      %29 = vector.broadcast %cst_23 : f32 to vector<8x128xf32>
      %30 = arith.maximumf %28, %29 : vector<8x128xf32>
      %31 = arith.truncf %30 : vector<8x128xf32> to vector<8x128xbf16>
      %c0_24 = arith.constant 0 : index
      %c0_25 = arith.constant 0 : index
      %32 = vector.load %arg7[%c0_24, %c0_25] : memref<128x128xbf16, #tpu.memory_space<vmem>>, vector<128x128xbf16>
      %cst_26 = arith.constant dense<0.000000e+00> : vector<8x128xf32>
      %33 = tpu.matmul %31, %32, %cst_26 {dimension_numbers = #tpu.dot_dimension_numbers<[1], [0], [0], [1], [0, 0, 1, 1], [], []>} : vector<8x128xbf16>, vector<128x128xbf16>, vector<8x128xf32> -> vector<8x128xf32>
      %c0_27 = arith.constant 0 : index
      %c0_28 = arith.constant 0 : index
      %34 = vector.load %arg8[%c0_27, %c0_28] : memref<1x128xf32, #tpu.memory_space<vmem>>, vector<1x128xf32>
      %35 = vector.broadcast %34 : vector<1x128xf32> to vector<8x128xf32>
      %36 = arith.addf %33, %35 : vector<8x128xf32>
      %c0_29 = arith.constant 0 : index
      %c0_30 = arith.constant 0 : index
      %37 = vector.load %arg9[%c0_29, %c0_30] : memref<8x128xf32, #tpu.memory_space<vmem>>, vector<8x128xf32>
      tpu.vector_store %arg9[%c0_29, %c0_30], %36 {strides = array<i32>} : memref<8x128xf32, #tpu.memory_space<vmem>>, vector<8x128xf32>,
    } else {
    }
    return
  }
  func.func @transform_0(%arg0: i32, %arg1: i32) -> (i32, i32, i32) {
    %c0_i32 = arith.constant 0 : i32
    %c0_i32_0 = arith.constant 0 : i32
    return %arg0, %arg1, %c0_i32 : i32, i32, i32
  }
  func.func @transform_1(%arg0: i32, %arg1: i32) -> (i32, i32) {
    %c0_i32 = arith.constant 0 : i32
    %c0_i32_0 = arith.constant 0 : i32
    %c0_i32_1 = arith.constant 0 : i32
    return %c0_i32, %c0_i32_0 : i32, i32
  }
  func.func @transform_2(%arg0: i32, %arg1: i32) -> (i32, i32) {
    %c0_i32 = arith.constant 0 : i32
    %c0_i32_0 = arith.constant 0 : i32
    %c0_i32_1 = arith.constant 0 : i32
    return %c0_i32, %c0_i32_0 : i32, i32
  }
  func.func @transform_3(%arg0: i32, %arg1: i32) -> (i32, i32) {
    %c0_i32 = arith.constant 0 : i32
    %c0_i32_0 = arith.constant 0 : i32
    %c0_i32_1 = arith.constant 0 : i32
    return %c0_i32, %c0_i32_0 : i32, i32
  }
  func.func @transform_4(%arg0: i32, %arg1: i32) -> (i32, i32) {
    %c0_i32 = arith.constant 0 : i32
    %c0_i32_0 = arith.constant 0 : i32
    %c0_i32_1 = arith.constant 0 : i32
    return %c0_i32, %c0_i32_0 : i32, i32
  }
  func.func @transform_5(%arg0: i32, %arg1: i32) -> (i32, i32) {
    %c0_i32 = arith.constant 0 : i32
    %c0_i32_0 = arith.constant 0 : i32
    %c0_i32_1 = arith.constant 0 : i32
    return %c0_i32, %c0_i32_0 : i32, i32
  }
  func.func @transform_6(%arg0: i32, %arg1: i32) -> (i32, i32) {
    %c0_i32 = arith.constant 0 : i32
    %c0_i32_0 = arith.constant 0 : i32
    %c0_i32_1 = arith.constant 0 : i32
    return %c0_i32, %c0_i32_0 : i32, i32
  }
  func.func @transform_7(%arg0: i32, %arg1: i32) -> (i32, i32) {
    %c0_i32 = arith.constant 0 : i32
    %c0_i32_0 = arith.constant 0 : i32
    return %arg0, %c0_i32 : i32, i32
  }
}

</mosaic_0001>

<bundles_post_ra>
// kernel: mlp_forward.1
= control target key start
LH: loop header
LB: loop body
LE: loop exit
PB: predicated region body
PF: predicated region fallthrough
CT: control target
= control target key end

     0   :  { %12 = vsyncpa [#allocation4], 0  ;;  %s607_s24 = smov [#allocation3]   ;;  %s759_s0 = inlined_call_operand.vmem [shape: bf16[8,8,32], index: 0, kind: input, shape index: {}]   ;;  %s760_s1 = inlined_call_operand.vmem [shape: bf16[32,128], index: 1, kind: input, shape index: {}]   ;;  %s761_s2 = inlined_call_operand.vmem [shape: f32[1,128], index: 2, kind: input, shape index: {}]   ;;  %s762_s3 = inlined_call_operand.vmem [shape: bf16[128,128], index: 3, kind: input, shape index: {}]   ;;  %s763_s4 = inlined_call_operand.vmem [shape: f32[1,128], index: 4, kind: input, shape index: {}]   ;;  %s764_s5 = inlined_call_operand.hbm [shape: bf16[128,128], index: 5, kind: input, shape index: {}]   ;;  %s765_s6 = inlined_call_operand.vmem [shape: f32[1,128], index: 6, kind: input, shape index: {}]   ;;  %s766_s7 = inlined_call_operand.vmem [shape: f32[8,128], index: 7, kind: output, shape index: {}]  }
   0x1   :  { %s28_s25 = sshll.u32 %s607_s24, 4  ;;  %s583_s28 = scalar_lea.hbm %s764_s5, 1024  ;;  %s29_s25 = int_to_ptr.vmem [resolvable:$true] %s28_s25 }
   0x2   :  { %p584_p0 = scmp.ne.s32.totalorder %s764_s5, %s583_s28  ;;  %p587_p1 = scmp.lt.u32.totalorder %s583_s28, %s764_s5 }
   0x4   :  { %p589_p2 = pnand %p587_p1, %p584_p0 }
   0x6   :  { %592 = shalt.err (!%p589_p2)
}
   0x7   :  { %s593_s10 = scalar_lea.vmem %s29_s25, 1024  ;;  %p598_p4 = scmp.lt.s32.totalorder %s29_s25, %s29_s25 }
   0x8   :  { %p594_p3 = scmp.ne.s32.totalorder %s29_s25, %s593_s10  ;;  %p599_p5 = scmp.lt.s32.totalorder %s593_s10, %s593_s10 }
   0xa   :  { %p600_p6 = por %p599_p5, %p598_p4 }
   0xc   :  { %p601_p7 = pnand %p600_p6, %p594_p3 }
   0xe   :  { %604 = shalt.err (!%p601_p7)
}
   0xf   :  { %s608_s11 = smov 64   ;;  %s609_s12 = smov 4  }
  0x10   :  { %34 = dma.hbm_to_vmem [thread:$0]  %s764_s5, 1024, %s29_s25, [#allocation4], %s608_s11, %s608_s11, %s609_s12  }
  0x11   :  { %605 = dma.done.wait [#allocation4], 1024  }
  0x12   :  { %606 = vsyncadd [#allocation4], 4294966272  ;;  %vm45_vm0 = vcmask 261120   ;;  %v610_v0 = vmov 0.0   ;;  %vm611_vm1 = vmmov 0   ;;  %v565_v1 = vld [vmem:[%s760_s1] sm:$0xff]  }
  0x13   :  { %512 = vmatprep.subr.bf16.mxu0 %v610_v0  ;;  %516 = vmatprep.mubr.msk.bf16.mxu0 %vm611_vm1, %v610_v0  ;;  %46 = vst.msk [vmem:[#allocation2] sm:$0xff] %vm45_vm0, %v610_v0  ;;  %v566_v2 = vld [vmem:[%s760_s1 + $0x8] sm:$0xff]   ;;  %v473_v3 = vld [vmem:[%s759_s0] sm:$0xff]   ;;  %v489_v9 = vld [vmem:[%s759_s0 + $0x10] sm:$0xff]   ;;  %vm129_vm2 = vcmask 1041409   ;;  %vm131_vm3 = vcmask 1042434  }
  0x14   :  { %520 = vmatprep.subr.bf16.mxu1 %v610_v0  ;;  %536 = vmatprep.mubr.msk.bf16.mxu1 %vm611_vm1, %v610_v0  ;;  %v488_v4 = vld [vmem:[%s759_s0 + $0x8] sm:$0xff]   ;;  %v474_v5 = vunpack.c.l.bf16 %v473_v3  ;;  %v475_v6 = vunpack.c.h.bf16 %v473_v3  ;;  %v490_v10 = vld [vmem:[%s759_s0 + $0x18] sm:$0xff]   ;;  %v482_v11 = vunpack.c.l.bf16 %v489_v9  ;;  %v483_v12 = vunpack.c.h.bf16 %v489_v9  ;;  %v567_v15 = vld [vmem:[%s762_s3] sm:$0xff]  }
  0x15   :  { %513 = vmatpush3.bf16.msra.mxu0 %v565_v1  ;;  %v478_v7 = vunpack.c.l.bf16 %v488_v4  ;;  %v479_v8 = vunpack.c.h.bf16 %v488_v4  ;;  %v486_v13 = vunpack.c.l.bf16 %v490_v10  ;;  %v487_v14 = vunpack.c.h.bf16 %v490_v10  ;;  %521 = vmatpush3.bf16.msra.mxu1 %v567_v15  ;;  %v568_v24 = vld [vmem:[%s762_s3 + $0x8] sm:$0xff]   ;;  %v569_v37 = vld [vmem:[%s762_s3 + $0x10] sm:$0xff]   ;;  %v570_v50 = vld [vmem:[%s762_s3 + $0x18] sm:$0xff]  }
  0x16   :  { %514 = vmatprep.subr.bf16.mxu0 %v610_v0  ;;  %v65_v16 = vsel %vm45_vm0, %v474_v5, 0.0  ;;  %v72_v17 = vsel %vm45_vm0, %v475_v6, 0.0  ;;  %v93_v25 = vsel %vm45_vm0, %v482_v11, 0.0  ;;  %v100_v26 = vsel %vm45_vm0, %v483_v12, 0.0  ;;  %522 = vmatprep.subr.bf16.mxu1 %v610_v0  ;;  %v571_v4 = vld [vmem:[%s762_s3 + $0x20] sm:$0xff]  }
  0x17   :  { %v79_v18 = vsel %vm45_vm0, %v478_v7, 0.0  ;;  %v86_v19 = vsel %vm45_vm0, %v479_v8, 0.0  ;;  %v66_v20 = vrot.slane %v65_v16, 4  ;;  %v73_v21 = vrot.slane %v72_v17, 4 }
  0x18   :  { %v80_v22 = vrot.slane %v79_v18, 4  ;;  %v87_v23 = vrot.slane %v86_v19, 4  ;;  %v107_v27 = vsel %vm45_vm0, %v486_v13, 0.0  ;;  %v114_v28 = vsel %vm45_vm0, %v487_v14, 0.0 }
  0x19   :  { %515 = vmatpush3.bf16.msra.mxu0 %v566_v2  ;;  %v67_v29 = vadd.f32 %v66_v20, %v65_v16  ;;  %v74_v30 = vadd.f32 %v73_v21, %v72_v17  ;;  %v94_v33 = vrot.slane %v93_v25, 4  ;;  %v101_v34 = vrot.slane %v100_v26, 4  ;;  %523 = vmatpush3.bf16.msra.mxu1 %v568_v24  ;;  %v572_v17 = vld [vmem:[%s762_s3 + $0x28] sm:$0xff]  }
  0x1a   :  { %540 = vmatprep.subr.bf16.mxu0 %v610_v0  ;;  %v81_v31 = vadd.f32 %v80_v22, %v79_v18  ;;  %v88_v32 = vadd.f32 %v87_v23, %v86_v19  ;;  %v108_v35 = vrot.slane %v107_v27, 4  ;;  %v115_v36 = vrot.slane %v114_v28, 4  ;;  %524 = vmatprep.subr.bf16.mxu1 %v610_v0  ;;  %v47_v18 = vld [vmem:[#allocation2] sm:$0xff] }
  0x1b   :  { %v68_v38 = vrot.slane %v67_v29, 2  ;;  %v75_v39 = vrot.slane %v74_v30, 2  ;;  %vm133_vm4 = vcmask 1043459   ;;  %v95_v42 = vadd.f32 %v94_v33, %v93_v25  ;;  %v580_v33 = vld [vmem:[#allocation3 + $0x28] sm:$0xff]  }
  0x1c   :  { %v82_v40 = vrot.slane %v81_v31, 2  ;;  %v89_v41 = vrot.slane %v88_v32, 2  ;;  %v102_v43 = vadd.f32 %v101_v34, %v100_v26  ;;  %v109_v44 = vadd.f32 %v108_v35, %v107_v27  ;;  %v573_v26 = vld [vmem:[%s762_s3 + $0x30] sm:$0xff]   ;;  %v574_v27 = vld [vmem:[%s762_s3 + $0x38] sm:$0xff]   ;;  %v450_v34 = vld [vmem:[%s761_s2] ss:$0 sm:$0xff] }
  0x1d   :  { %v116_v45 = vadd.f32 %v115_v36, %v114_v28  ;;  %vm135_vm5 = vcmask 1044484   ;;  %v69_v46 = vadd.f32 %v68_v38, %v67_v29  ;;  %v76_v47 = vadd.f32 %v75_v39, %v74_v30  ;;  %525 = vmatpush3.bf16.msra.mxu1 %v569_v37  ;;  %v575_v28 = vld [vmem:[#allocation3] sm:$0xff]   ;;  %v576_v29 = vld [vmem:[#allocation3 + $0x8] sm:$0xff]   ;;  %v577_v30 = vld [vmem:[#allocation3 + $0x10] sm:$0xff]  }
  0x1e   :  { %v83_v48 = vadd.f32 %v82_v40, %v81_v31  ;;  %v90_v49 = vadd.f32 %v89_v41, %v88_v32  ;;  %vm137_vm6 = vcmask 1045509   ;;  %v96_v51 = vrot.slane %v95_v42, 2  ;;  %526 = vmatprep.subr.bf16.mxu1 %v610_v0  ;;  %v578_v31 = vld [vmem:[#allocation3 + $0x18] sm:$0xff]   ;;  %v579_v32 = vld [vmem:[#allocation3 + $0x20] sm:$0xff]  }
  0x1f   :  { %v103_v52 = vrot.slane %v102_v43, 2  ;;  %v110_v53 = vrot.slane %v109_v44, 2  ;;  %v117_v54 = vrot.slane %v116_v45, 2  ;;  %v70_v55 = vrot.slane %v69_v46, 1 }
  0x20   :  { %v77_v56 = vrot.slane %v76_v47, 1  ;;  %v84_v57 = vrot.slane %v83_v48, 1  ;;  %v91_v58 = vrot.slane %v90_v49, 1  ;;  %v97_v59 = vadd.f32 %v96_v51, %v95_v42  ;;  %v581_v42 = vld [vmem:[#allocation3 + $0x30] sm:$0xff]  }
  0x21   :  { %v104_v60 = vadd.f32 %v103_v52, %v102_v43  ;;  %v111_v61 = vadd.f32 %v110_v53, %v109_v44  ;;  %v118_v62 = vadd.f32 %v117_v54, %v116_v45  ;;  %v71_v63 = vadd.f32 %v70_v55, %v69_v46  ;;  %527 = vmatpush3.bf16.msra.mxu1 %v570_v50  ;;  %v582_v43 = vld [vmem:[#allocation3 + $0x38] sm:$0xff]  }
  0x22   :  { %v78_v1 = vadd.f32 %v77_v56, %v76_v47  ;;  %v85_v2 = vadd.f32 %v84_v57, %v83_v48  ;;  %v92_v3 = vadd.f32 %v91_v58, %v90_v49  ;;  %v98_v5 = vrot.slane %v97_v59, 1  ;;  %528 = vmatprep.subr.bf16.mxu1 %v610_v0  ;;  %v454_v44 = vld [vmem:[%s763_s4] ss:$0 sm:$0xff] }
  0x23   :  { %v105_v6 = vrot.slane %v104_v60, 1  ;;  %v112_v7 = vrot.slane %v111_v61, 1  ;;  %v119_v8 = vrot.slane %v118_v62, 1  ;;  %vm139_vm7 = vcmask 1046534   ;;  %v463_v52 = vld [vmem:[%s765_s6] ss:$0 sm:$0xff] }
  0x24   :  { %v130_v9 = vsel %vm129_vm2, %v78_v1, %v71_v63  ;;  %v99_v10 = vadd.f32 %v98_v5, %v97_v59  ;;  %vm141_vm8 = vcmask 1047559  }
  0x25   :  { %v106_v11 = vadd.f32 %v105_v6, %v104_v60  ;;  %v113_v12 = vadd.f32 %v112_v7, %v111_v61  ;;  %v132_v13 = vsel %vm131_vm3, %v85_v2, %v130_v9  ;;  %v120_v14 = vadd.f32 %v119_v8, %v118_v62  ;;  %529 = vmatpush3.bf16.msra.mxu1 %v571_v4 }
  0x26   :  { %v134_v15 = vsel %vm133_vm4, %v92_v3, %v132_v13  ;;  %530 = vmatprep.subr.bf16.mxu1 %v610_v0 }
  0x27   :  { %v136_v16 = vsel %vm135_vm5, %v99_v10, %v134_v15 }
  0x28   :  { %v138_v19 = vsel %vm137_vm6, %v106_v11, %v136_v16 }
  0x29   :  { %v140_v20 = vsel %vm139_vm7, %v113_v12, %v138_v19  ;;  %531 = vmatpush3.bf16.msra.mxu1 %v572_v17 }
  0x2a   :  { %v142_v21 = vsel %vm141_vm8, %v120_v14, %v140_v20  ;;  %532 = vmatprep.subr.bf16.mxu1 %v610_v0 }
  0x2b   :  { %v144_v22 = vadd.f32 %v142_v21, %v47_v18 }
  0x2d   :  { %145 = vst.msk [vmem:[#allocation2] sm:$0xff] %vm45_vm0, %v144_v22  ;;  %533 = vmatpush3.bf16.msra.mxu1 %v573_v26 }
  0x2e   :  { %534 = vmatprep.subr.bf16.mxu1 %v610_v0 }
  0x31   :  { %535 = vmatpush3.bf16.msra.mxu1 %v574_v27 }
  0x34   :  { %v149_v23 = vld [vmem:[#allocation2] sm:$0xff] }
  0x35   :  { %v150_v24 = vmul.f32 0.125, %v149_v23 }
  0x37   :  { %v151_v25 = vpack.c.bf16 %v150_v24, %v150_v24 }
  0x39   :  { %517 = vmatmul.mubr.msk.bf16.vlgmr.msra.gmra.mrb[0].mxu0 %vm45_vm0, %v151_v25 }
  0x3a   :  { %556 = vmatprep.mubr.msk.bf16.mxu0 %vm611_vm1, %v610_v0  ;;  %541 = vmatpush3.bf16.msra.mxu0 %v575_v28 }
  0x3b   :  { %542 = vmatprep.subr.bf16.mxu0 %v610_v0 }
  0x3e   :  { %543 = vmatpush3.bf16.msra.mxu0 %v576_v29 }
  0x3f   :  { %544 = vmatprep.subr.bf16.mxu0 %v610_v0 }
  0x42   :  { %545 = vmatpush3.bf16.msra.mxu0 %v577_v30 }
  0x43   :  { %546 = vmatprep.subr.bf16.mxu0 %v610_v0 }
  0x46   :  { %547 = vmatpush3.bf16.msra.mxu0 %v578_v31 }
  0x47   :  { %548 = vmatprep.subr.bf16.mxu0 %v610_v0 }
  0x4a   :  { %549 = vmatpush3.bf16.msra.mxu0 %v579_v32 }
  0x4b   :  { %550 = vmatprep.subr.bf16.mxu0 %v610_v0 }
  0x4e   :  { %551 = vmatpush3.bf16.msra.mxu0 %v580_v33 }
  0x4f   :  { %552 = vmatprep.subr.bf16.mxu0 %v610_v0 }
  0x52   :  { %553 = vmatpush3.bf16.msra.mxu0 %v581_v42 }
  0x53   :  { %554 = vmatprep.subr.bf16.mxu0 %v610_v0 }
  0x56   :  { %555 = vmatpush3.bf16.msra.mxu0 %v582_v43 }
 0x10c   :  { %v212_v35 = vpop.f32.mrb[0].mxu0 }
 0x10d   :  { %v213_v36 = vadd.f32 %v450_v34, %v212_v35  ;;  %v518_v37 = vpop.f32.mrb[1].mxu0 }
 0x10e   :  { %v215_v38 = vpop.f32.mrb[2].mxu0 }
 0x10f   :  { %v218_v39 = vmax.f32 %v213_v36, 0.0  ;;  %v519_v40 = vpop.f32.mrb[3].mxu0 }
 0x111   :  { %v219_v41 = vpack.c.bf16 %v218_v39, %v218_v39 }
 0x113   :  { %537 = vmatmul.mubr.bf16.vlgmr.msra.gmra.mrb[0].mxu1 %v219_v41 }
 0x1e6   :  { %v325_v45 = vpop.f32.mrb[0].mxu1 }
 0x1e7   :  { %v326_v46 = vadd.f32 %v454_v44, %v325_v45  ;;  %v538_v47 = vpop.f32.mrb[1].mxu1 }
 0x1e8   :  { %v328_v48 = vpop.f32.mrb[2].mxu1 }
 0x1e9   :  { %v331_v49 = vmax.f32 %v326_v46, 0.0  ;;  %v539_v50 = vpop.f32.mrb[3].mxu1 }
 0x1eb   :  { %v332_v51 = vpack.c.bf16 %v331_v49, %v331_v49 }
 0x1ed   :  { %557 = vmatmul.mubr.bf16.vlgmr.msra.gmra.mrb[4].mxu0 %v332_v51 }
 0x2c0   :  { %v438_v53 = vpop.f32.mrb[4].mxu0 }
 0x2c1   :  { %v439_v0 = vadd.f32 %v463_v52, %v438_v53  ;;  %v558_v54 = vpop.f32.mrb[5].mxu0 }
 0x2c2   :  { %v441_v55 = vpop.f32.mrb[6].mxu0 }
 0x2c3   :  { %444 = vst [vmem:[%s766_s7] sm:$0xff] %v439_v0  ;;  %v559_v56 = vpop.f32.mrb[7].mxu0 }
 0x2c4   :  { %449 = vsyncpa [#allocation4], 1 }

</bundles_post_ra>
